<compile_context>
chip_gen: v7x
topology: tpu7x:2x2x1
jax: 0.10.0
libtpu: 0.0.40
codegen_flags: <defaults>
</compile_context>

<pallas_src>
import functools

import jax
import jax.numpy as jnp
from jax import lax
from jax.experimental import pallas as pl
from jax.experimental.pallas import tpu as pltpu

_LANES = 128
_SUBLANES = 8
_MAX_BLOCK_ROWS = 2048  # 2048 x 128 x 4B = 1 MiB per input per grid step


def _flow_loss_body(pred_ref, gt_ref, w_ref, out_ref, acc_ref, *,
                    block_rows, steps_per_split, total_rows, needs_mask,
                    use_student_t_loss, nu, use_squared_weighting):
    s = pl.program_id(0)   # split (parallel) axis
    i = pl.program_id(1)   # streaming (arbitrary) axis

    @pl.when(i == 0)
    def _():
        acc_ref[...] = jnp.zeros_like(acc_ref)

    diff = (gt_ref[...] - pred_ref[...]).astype(jnp.float32)
    if w_ref is None:
        err = diff * diff
    else:
        w = w_ref[...].astype(jnp.float32)
        if use_squared_weighting:
            scaled = diff / w
            err = scaled * scaled
        else:
            err = (diff * diff) / w

    if use_student_t_loss:
        err = 0.5 * (nu + 1.0) * jnp.log(1.0 + err / nu)

    if needs_mask:
        # Rows beyond the true row count (partial last block / clamped blocks)
        # contain undefined data: zero them before accumulating.
        row0 = (s * steps_per_split + i) * block_rows
        row_ids = row0 + lax.broadcasted_iota(jnp.int32, err.shape, 0)
        err = jnp.where(row_ids < total_rows, err, 0.0)

    # Fold the (block_rows, 128) error tile down to one (8, 128) partial-sum
    # tile on the VPU; the final cross-lane reduce happens once in the wrapper.
    acc_ref[...] += err.reshape(-1, _SUBLANES, _LANES).sum(axis=0)

    @pl.when(i == pl.num_programs(1) - 1)
    def _():
        out_ref[...] = acc_ref[...]


def _kernel_with_w(pred_ref, gt_ref, w_ref, out_ref, acc_ref, **kw):
    _flow_loss_body(pred_ref, gt_ref, w_ref, out_ref, acc_ref, **kw)


def _kernel_no_w(pred_ref, gt_ref, out_ref, acc_ref, **kw):
    _flow_loss_body(pred_ref, gt_ref, None, out_ref, acc_ref, **kw)


def _round_up(x, m):
    return ((x + m - 1) // m) * m


def scaled_flow_loss(pred_flow, gt_flow, weighting=None, *,
                     use_student_t_loss=False, nu=1.0,
                     use_squared_weighting=False):
    """Mean of weighted squared flow error (optionally Student-t / Cauchy form)."""
    n = int(pred_flow.size)
    has_w = weighting is not None

    # Flatten to a lane-dense [rows, 128] slab.  Only the ragged tail (if any)
    # is padded so the padded elements contribute exactly 0.
    chunk = _SUBLANES * _LANES
    padded = _round_up(n, chunk)

    def to_slab(x, fill):
        x = x.reshape(-1)
        if x.dtype != jnp.float32:
            # TODO(synk): stream bf16 directly and upcast in-kernel to halve
            # HBM traffic for bf16 flow nets (needs (16,128) sublane tiling).
            x = x.astype(jnp.float32)
        if padded != n:
            x = jnp.pad(x, (0, padded - n), constant_values=fill)
        return x.reshape(-1, _LANES)

    inputs = [to_slab(pred_flow, 0.0), to_slab(gt_flow, 0.0)]
    if has_w:
        inputs.append(to_slab(weighting, 1.0))

    rows = padded // _LANES                       # multiple of 8
    block_rows = min(_MAX_BLOCK_ROWS, rows)       # multiple of 8
    num_blocks = pl.cdiv(rows, block_rows)
    num_splits = min(2, num_blocks)               # v7x megacore partials
    steps_per_split = pl.cdiv(num_blocks, num_splits)
    needs_mask = num_splits * steps_per_split * block_rows > rows

    def in_index(s, i):
        # Clamp so every block start is in-bounds; clamped duplicates and the
        # partial last block are zeroed by the in-kernel row mask.
        return (jnp.minimum(s * steps_per_split + i, num_blocks - 1), 0)

    in_specs = [pl.BlockSpec((block_rows, _LANES), in_index)] * len(inputs)

    kernel = functools.partial(
        _kernel_with_w if has_w else _kernel_no_w,
        block_rows=block_rows,
        steps_per_split=steps_per_split,
        total_rows=rows,
        needs_mask=needs_mask,
        use_student_t_loss=use_student_t_loss,
        nu=float(nu),
        use_squared_weighting=use_squared_weighting,
    )

    cost = pl.CostEstimate(
        flops=6 * n,
        transcendentals=n if use_student_t_loss else 0,
        bytes_accessed=len(inputs) * n * 4 + num_splits * _SUBLANES * _LANES * 4,
    )

    partials = pl.pallas_call(
        kernel,
        out_shape=jax.ShapeDtypeStruct((num_splits * _SUBLANES, _LANES),
                                       jnp.float32),
        grid_spec=pltpu.PrefetchScalarGridSpec(
            num_scalar_prefetch=0,
            grid=(num_splits, steps_per_split),
            in_specs=in_specs,
            out_specs=pl.BlockSpec((_SUBLANES, _LANES), lambda s, i: (s, 0)),
            scratch_shapes=[pltpu.VMEM((_SUBLANES, _LANES), jnp.float32)],
        ),
        compiler_params=pltpu.CompilerParams(
            dimension_semantics=("parallel", "arbitrary")),
        cost_estimate=cost,
    )(*inputs)

    return jnp.sum(partials) / jnp.float32(n)


def _reference_loss(pred, gt, weighting=None, *, use_student_t_loss=False,
                    nu=1.0, use_squared_weighting=False):
    if weighting is None:
        weighting = jnp.ones_like(gt)
    if use_squared_weighting:
        werr = jnp.square((gt - pred) / weighting)
    else:
        werr = jnp.square(gt - pred) / weighting
    if use_student_t_loss:
        return jnp.mean(0.5 * (nu + 1.0) * jnp.log(1.0 + werr / nu))
    return jnp.mean(werr)


if __name__ == "__main__":
    key = jax.random.PRNGKey(0)
    k1, k2, k3 = jax.random.split(key, 3)

    configs = [
        dict(use_student_t_loss=False, nu=1.0, use_squared_weighting=False),
        dict(use_student_t_loss=False, nu=1.0, use_squared_weighting=True),
        dict(use_student_t_loss=True, nu=1.0, use_squared_weighting=False),
        dict(use_student_t_loss=True, nu=2.0, use_squared_weighting=True),
    ]

    ok = True

    # Small flow-like tensors [B, C, H, W]: single block, no masking.
    shape = (2, 4, 16, 16)
    pred = jax.random.normal(k1, shape, dtype=jnp.float32)
    gt = jax.random.normal(k2, shape, dtype=jnp.float32)
    weighting = jax.random.uniform(k3, shape, dtype=jnp.float32,
                                   minval=0.5, maxval=2.0)
    for cfg in configs:
        for w in (None, weighting):
            got = jax.block_until_ready(scaled_flow_loss(pred, gt, w, **cfg))
            want = _reference_loss(pred, gt, w, **cfg)
            if not jnp.allclose(got, want, rtol=1e-4, atol=1e-6):
                ok = False

    # Larger shape exercising multi-block streaming, the 2-split grid, block
    # clamping and the partial-block row mask (rows=5000, block=2048 -> 3 blocks
    # over a 2x2 grid).
    shape2 = (2, 2, 400, 400)
    pred2 = jax.random.normal(k1, shape2, dtype=jnp.float32)
    gt2 = jax.random.normal(k2, shape2, dtype=jnp.float32)
    w2 = jax.random.uniform(k3, shape2, dtype=jnp.float32,
                            minval=0.5, maxval=2.0)
    for cfg in (configs[0], configs[3]):
        for w in (None, w2):
            got = jax.block_until_ready(scaled_flow_loss(pred2, gt2, w, **cfg))
            want = _reference_loss(pred2, gt2, w, **cfg)
            if not jnp.allclose(got, want, rtol=1e-4, atol=1e-6):
                ok = False

    print("KERNEL_OK" if ok else "KERNEL_MISMATCH")
</pallas_src>

<mosaic_0001>
module attributes {stable_mosaic.version = 11 : i64} {
  func.func @_kernel_no_w(%arg0: i32, %arg1: i32, %arg2: memref<16x128xf32, #tpu.memory_space<vmem>>, %arg3: memref<16x128xf32, #tpu.memory_space<vmem>>, %arg4: memref<8x128xf32, #tpu.memory_space<vmem>>, %arg5: memref<8x128xf32, #tpu.memory_space<vmem>>) attributes {dimension_semantics = [#tpu.dimension_semantics<parallel>, #tpu.dimension_semantics<arbitrary>], iteration_bounds = array<i64: 1, 1>, scalar_prefetch = 0 : i64, scratch_operands = 1 : i64, tpu.core_type = #tpu.core_type<tc>, window_params = [{transform_indices = @transform_0, window_bounds = array<i64: 16, 128>}, {transform_indices = @transform_1, window_bounds = array<i64: 16, 128>}, {transform_indices = @transform_2, window_bounds = array<i64: 8, 128>}]} {
    %c0_i32 = arith.constant 0 : i32
    %0 = arith.cmpi eq, %arg1, %c0_i32 : i32
    %1 = arith.extui %0 : i1 to i32
    %c0_i32_0 = arith.constant 0 : i32
    %2 = arith.cmpi ne, %1, %c0_i32_0 : i32
    scf.if %2 {
      %cst_10 = arith.constant 0.000000e+00 : f32
      %15 = vector.broadcast %cst_10 : f32 to vector<8x128xf32>
      %c0_11 = arith.constant 0 : index
      %c0_12 = arith.constant 0 : index
      %16 = vector.load %arg5[%c0_11, %c0_12] : memref<8x128xf32, #tpu.memory_space<vmem>>, vector<8x128xf32>
      tpu.vector_store %arg5[%c0_11, %c0_12], %15 {strides = array<i32>} : memref<8x128xf32, #tpu.memory_space<vmem>>, vector<8x128xf32>,
    } else {
    }
    %c0 = arith.constant 0 : index
    %c0_1 = arith.constant 0 : index
    %3 = vector.load %arg3[%c0, %c0_1] : memref<16x128xf32, #tpu.memory_space<vmem>>, vector<16x128xf32>
    %c0_2 = arith.constant 0 : index
    %c0_3 = arith.constant 0 : index
    %4 = vector.load %arg2[%c0_2, %c0_3] : memref<16x128xf32, #tpu.memory_space<vmem>>, vector<16x128xf32>
    %5 = arith.subf %3, %4 : vector<16x128xf32>
    %6 = arith.mulf %5, %5 : vector<16x128xf32>
    %c0_4 = arith.constant 0 : index
    %c0_5 = arith.constant 0 : index
    %7 = vector.load %arg5[%c0_4, %c0_5] : memref<8x128xf32, #tpu.memory_space<vmem>>, vector<8x128xf32>
    %8 = vector.shape_cast %6 : vector<16x128xf32> to vector<2x8x128xf32>
    %cst = arith.constant dense<0.000000e+00> : vector<8x128xf32>
    %9 = vector.multi_reduction <add>, %8, %cst [0] : vector<2x8x128xf32> to vector<8x128xf32>
    %10 = arith.addf %7, %9 : vector<8x128xf32>
    %c0_6 = arith.constant 0 : index
    %c0_7 = arith.constant 0 : index
    %11 = vector.load %arg5[%c0_6, %c0_7] : memref<8x128xf32, #tpu.memory_space<vmem>>, vector<8x128xf32>
    tpu.vector_store %arg5[%c0_6, %c0_7], %10 {strides = array<i32>} : memref<8x128xf32, #tpu.memory_space<vmem>>, vector<8x128xf32>,
    %c0_i32_8 = arith.constant 0 : i32
    %12 = arith.cmpi eq, %arg1, %c0_i32_8 : i32
    %13 = arith.extui %12 : i1 to i32
    %c0_i32_9 = arith.constant 0 : i32
    %14 = arith.cmpi ne, %13, %c0_i32_9 : i32
    scf.if %14 {
      %c0_10 = arith.constant 0 : index
      %c0_11 = arith.constant 0 : index
      %15 = vector.load %arg5[%c0_10, %c0_11] : memref<8x128xf32, #tpu.memory_space<vmem>>, vector<8x128xf32>
      %c0_12 = arith.constant 0 : index
      %c0_13 = arith.constant 0 : index
      %16 = vector.load %arg4[%c0_12, %c0_13] : memref<8x128xf32, #tpu.memory_space<vmem>>, vector<8x128xf32>
      tpu.vector_store %arg4[%c0_12, %c0_13], %15 {strides = array<i32>} : memref<8x128xf32, #tpu.memory_space<vmem>>, vector<8x128xf32>,
    } else {
    }
    return
  }
  func.func @transform_0(%arg0: i32, %arg1: i32) -> (i32, i32) {
    %c1_i32 = arith.constant 1 : i32
    %0 = arith.muli %arg0, %c1_i32 : i32
    %1 = arith.addi %0, %arg1 : i32
    %c0_i32 = arith.constant 0 : i32
    %2 = arith.minsi %1, %c0_i32 : i32
    %c0_i32_0 = arith.constant 0 : i32
    %c0_i32_1 = arith.constant 0 : i32
    return %2, %c0_i32_0 : i32, i32
  }
  func.func @transform_1(%arg0: i32, %arg1: i32) -> (i32, i32) {
    %c1_i32 = arith.constant 1 : i32
    %0 = arith.muli %arg0, %c1_i32 : i32
    %1 = arith.addi %0, %arg1 : i32
    %c0_i32 = arith.constant 0 : i32
    %2 = arith.minsi %1, %c0_i32 : i32
    %c0_i32_0 = arith.constant 0 : i32
    %c0_i32_1 = arith.constant 0 : i32
    return %2, %c0_i32_0 : i32, i32
  }
  func.func @transform_2(%arg0: i32, %arg1: i32) -> (i32, i32) {
    %c0_i32 = arith.constant 0 : i32
    %c0_i32_0 = arith.constant 0 : i32
    return %arg0, %c0_i32 : i32, i32
  }
}

</mosaic_0001>

<bundles_post_ra>
// kernel: tpu_custom_call.1
= control target key start
LH: loop header
LB: loop body
LE: loop exit
PB: predicated region body
PF: predicated region fallthrough
CT: control target
= control target key end

     0   :  { %7 = vsyncpa [#allocation4], 0  ;;  %s235_s0 = inlined_call_operand.hbm [shape: f32[16,128], index: 0, kind: input, shape index: {}]   ;;  %s236_s1 = inlined_call_operand.hbm [shape: f32[16,128], index: 1, kind: input, shape index: {}]   ;;  %s237_s2 = inlined_call_operand.hbm [shape: f32[8,128], index: 2, kind: output, shape index: {}]  }
   0x1   :  { %8 = vsyncpa [#allocation7], 0 }
   0x2   :  { %9 = vsyncpa [#allocation5], 0  ;;  %s179_s9 = smov [#allocation3]   ;;  %s107_s13 = scalar_lea.hbm %s235_s0, 256 }
   0x3   :  { %s21_s10 = sshll.u32 %s179_s9, 4  ;;  %p108_p0 = scmp.ne.s32.totalorder %s235_s0, %s107_s13  ;;  %s22_s10 = int_to_ptr.vmem [resolvable:$true] %s21_s10 }
   0x4   :  { %p111_p1 = scmp.lt.u32.totalorder %s107_s13, %s235_s0 }
   0x6   :  { %p113_p2 = pnand %p111_p1, %p108_p0 }
   0x8   :  { %116 = shalt.err (!%p113_p2)
}
   0x9   :  { %s117_s18 = scalar_lea.vmem %s22_s10, 256  ;;  %p122_p4 = scmp.lt.s32.totalorder %s22_s10, %s22_s10 }
   0xa   :  { %p118_p3 = scmp.ne.s32.totalorder %s22_s10, %s117_s18  ;;  %p123_p5 = scmp.lt.s32.totalorder %s117_s18, %s117_s18 }
   0xc   :  { %p124_p6 = por %p123_p5, %p122_p4 }
   0xe   :  { %p125_p7 = pnand %p124_p6, %p118_p3 }
  0x10   :  { %128 = shalt.err (!%p125_p7)
}
  0x11   :  { %s180_s19 = smov 128   ;;  %s181_s20 = smov 8  }
  0x12   :  { %27 = dma.hbm_to_vmem [thread:$0]  %s235_s0, 256, %s22_s10, [#allocation4], %s180_s19, %s180_s19, %s181_s20  }
  0x13   :  { %s182_s23 = smov [#allocation6]   ;;  %s129_s27 = scalar_lea.hbm %s236_s1, 256 }
  0x14   :  { %s39_s24 = sshll.u32 %s182_s23, 4  ;;  %p130_p8 = scmp.ne.s32.totalorder %s236_s1, %s129_s27  ;;  %s40_s24 = int_to_ptr.vmem [resolvable:$true] %s39_s24 }
  0x15   :  { %p133_p9 = scmp.lt.u32.totalorder %s129_s27, %s236_s1 }
  0x17   :  { %p135_p10 = pnand %p133_p9, %p130_p8 }
  0x19   :  { %138 = shalt.err (!%p135_p10)
}
  0x1a   :  { %s139_s4 = scalar_lea.vmem %s40_s24, 256  ;;  %p144_p12 = scmp.lt.s32.totalorder %s40_s24, %s40_s24 }
  0x1b   :  { %p140_p11 = scmp.ne.s32.totalorder %s40_s24, %s139_s4  ;;  %p145_p13 = scmp.lt.s32.totalorder %s139_s4, %s139_s4 }
  0x1d   :  { %p146_p0 = por %p145_p13, %p144_p12 }
  0x1f   :  { %p147_p1 = pnand %p146_p0, %p140_p11 }
  0x21   :  { %150 = shalt.err (!%p147_p1)
}
  0x22   :  { %45 = dma.hbm_to_vmem [thread:$0]  %s236_s1, 256, %s40_s24, [#allocation7], %s180_s19, %s180_s19, %s181_s20  }
  0x23   :  { %173 = dma.done.wait [#allocation4], 256  }
  0x24   :  { %174 = vsyncadd [#allocation4], 4294967040 }
  0x25   :  { %175 = dma.done.wait [#allocation7], 256  }
  0x26   :  { %176 = vsyncadd [#allocation7], 4294967040  ;;  %v65_v0 = vld [vmem:[#allocation6] sm:$0xff]  ;;  %v66_v1 = vld [vmem:[#allocation6 + $0x8] sm:$0xff]  ;;  %s183_s6 = smov [#allocation8]  }
  0x27   :  { %v67_v2 = vld [vmem:[#allocation3] sm:$0xff]  ;;  %v68_v3 = vld [vmem:[#allocation3 + $0x8] sm:$0xff]  ;;  %s88_s7 = sshll.u32 %s183_s6, 4  ;;  %s89_s7 = int_to_ptr.vmem [resolvable:$true] %s88_s7 }
  0x28   :  { %v69_v4 = vsub.f32 %v65_v0, %v67_v2  ;;  %v70_v5 = vsub.f32 %v66_v1, %v68_v3  ;;  %s151_s8 = scalar_lea.vmem %s89_s7, 128  ;;  %p156_p3 = scmp.lt.s32.totalorder %s89_s7, %s89_s7 }
  0x29   :  { %p152_p2 = scmp.ne.s32.totalorder %s89_s7, %s151_s8  ;;  %p157_p4 = scmp.lt.s32.totalorder %s151_s8, %s151_s8 }
  0x2a   :  { %v71_v6 = vmul.f32 %v69_v4, %v69_v4  ;;  %v72_v7 = vmul.f32 %v70_v5, %v70_v5 }
  0x2b   :  { %p158_p5 = por %p157_p4, %p156_p3 }
  0x2c   :  { %v74_v8 = vadd.f32 %v72_v7, %v71_v6 }
  0x2d   :  { %p159_p6 = pnand %p158_p5, %p152_p2 }
  0x2e   :  { %81 = vst [vmem:[#allocation8] sm:$0xff] %v74_v8 }
  0x2f   :  { %162 = shalt.err (!%p159_p6)
}
  0x30   :  { %s163_s10 = scalar_lea.hbm %s237_s2, 128 }
  0x31   :  { %p164_p7 = scmp.ne.s32.totalorder %s237_s2, %s163_s10  ;;  %p167_p8 = scmp.lt.u32.totalorder %s163_s10, %s237_s2 }
  0x33   :  { %p169_p9 = pnand %p167_p8, %p164_p7 }
  0x35   :  { %172 = shalt.err (!%p169_p9)
}
  0x36   :  { %91 = dma.vmem_to_hbm [thread:$0]  %s89_s7, 128, %s237_s2, [#allocation5]  }
  0x37   :  { %177 = dma.done.wait [#allocation5], 128  }
  0x38   :  { %178 = vsyncadd [#allocation5], 4294967168 }
  0x39   :  { %95 = vsyncpa [#allocation4], 1 }
  0x3a   :  { %96 = vsyncpa [#allocation7], 1 }
  0x3b   :  { %97 = vsyncpa [#allocation5], 1 }

</bundles_post_ra>
